<compile_context>
chip_gen: v5e
topology: v5e:2x2
jax: 0.10.0
libtpu: 0.0.40
codegen_flags: <defaults>
</compile_context>

<pallas_src>
import jax
import jax.numpy as jnp
from jax.experimental import pallas as pl
from jax.experimental.pallas import tpu as pltpu


def _bilinear_matrix(in_size: int, out_size: int, scale_factor: float) -> jnp.ndarray:
    """Dense (out_size, in_size) interpolation matrix matching PyTorch's
    bilinear upsampling with align_corners=False (explicit scale_factor =>
    source index uses 1/scale_factor; negative sources clamped to 0)."""
    dst = jnp.arange(out_size, dtype=jnp.float32)
    src = (dst + 0.5) / float(scale_factor) - 0.5
    src = jnp.maximum(src, 0.0)          # PyTorch clamps negative src (non-cubic)
    i0 = jnp.floor(src).astype(jnp.int32)
    i0 = jnp.minimum(i0, in_size - 1)
    i1 = jnp.minimum(i0 + 1, in_size - 1)
    w1 = src - i0.astype(jnp.float32)
    w0 = 1.0 - w1
    rows = jnp.arange(out_size)
    m = jnp.zeros((out_size, in_size), jnp.float32)
    m = m.at[rows, i0].add(w0)
    m = m.at[rows, i1].add(w1)
    return m


def _choose_block_batch(nc, h_in, w_in, h_out, w_out, itemsize,
                        budget_bytes=4 * 1024 * 1024):
    """Largest divisor of nc such that the double-buffered (in + out) tile
    stays within ~budget_bytes of VMEM."""
    per_plane = 2 * (h_in * w_in + h_out * w_out) * int(itemsize)  # 2x double-buffer
    b = max(1, min(nc, budget_bytes // max(per_plane, 1)))
    while nc % b:
        b -= 1
    return b


def _interp_kernel(x_ref, wh_ref, wwt_ref, o_ref):
    # x_ref:   (B, H_in,  W_in)   B planes of the (N*C) batch
    # wh_ref:  (H_out, H_in)
    # wwt_ref: (W_in,  W_out)     pre-transposed on the host
    # o_ref:   (B, H_out, W_out)
    b, h_in, w_in = x_ref.shape
    h_out = wh_ref.shape[0]
    w_out = wwt_ref.shape[1]

    x = x_ref[...]                                   # (B, H_in, W_in)

    # Step 1: W contraction as ONE flat GEMM over all planes in the block.
    #   (B*H_in, W_in) @ (W_in, W_out) -> (B*H_in, W_out)
    t = jnp.dot(x.reshape(b * h_in, w_in), wwt_ref[...],
                preferred_element_type=jnp.float32)
    t = t.reshape(b, h_in, w_out)                    # (B, H_in, W_out), f32

    # Step 2: H contraction, batched over B.  Output comes out in
    # (B, H_out, W_out) order directly — no lane/sublane transposes.
    wh_b = jnp.broadcast_to(wh_ref[...].astype(jnp.float32), (b, h_out, h_in))
    o = jnp.einsum("boh,bhw->bow", wh_b, t,
                   preferred_element_type=jnp.float32)
    o_ref[...] = o.astype(o_ref.dtype)


def interpolate_bilinear(x: jnp.ndarray, scale_factor: float = 2.0) -> jnp.ndarray:
    """x: (N, C, H, W) -> (N, C, floor(H*s), floor(W*s)); bilinear,
    align_corners=False, matching torch.nn.functional.interpolate."""
    n, c, h_in, w_in = x.shape
    h_out = int(h_in * scale_factor)
    w_out = int(w_in * scale_factor)

    wh = _bilinear_matrix(h_in, h_out, scale_factor)       # (H_out, H_in)
    wwt = _bilinear_matrix(w_in, w_out, scale_factor).T    # (W_in, W_out), host-side .T

    # bf16 inputs -> bf16 MXU operands for the big flat GEMM
    # (f32 accumulation kept in-kernel via preferred_element_type).
    if x.dtype == jnp.bfloat16:
        wh = wh.astype(jnp.bfloat16)
        wwt = wwt.astype(jnp.bfloat16)

    nc = n * c
    x_flat = x.reshape(nc, h_in, w_in)

    b = _choose_block_batch(nc, h_in, w_in, h_out, w_out, x.dtype.itemsize)
    grid = (nc // b,)

    # TODO(synk): for very large H (H_in >= ~1024) the dense Wh no longer fits
    # comfortably in VMEM; tile H_out as an extra grid axis or switch the H
    # contraction to the sparse 2-tap (two-row weighted add) formulation.
    out_flat = pl.pallas_call(
        _interp_kernel,
        out_shape=jax.ShapeDtypeStruct((nc, h_out, w_out), x.dtype),
        grid_spec=pltpu.PrefetchScalarGridSpec(
            num_scalar_prefetch=0,
            grid=grid,
            in_specs=[
                pl.BlockSpec((b, h_in, w_in), lambda i: (i, 0, 0)),
                pl.BlockSpec((h_out, h_in), lambda i: (0, 0)),
                pl.BlockSpec((w_in, w_out), lambda i: (0, 0)),
            ],
            out_specs=pl.BlockSpec((b, h_out, w_out), lambda i: (i, 0, 0)),
        ),
        compiler_params=pltpu.CompilerParams(
            dimension_semantics=("parallel",)),
    )(x_flat, wh, wwt)

    return out_flat.reshape(n, c, h_out, w_out)


if __name__ == "__main__":
    key = jax.random.PRNGKey(0)
    # Small shapes consistent with the module's forward: NCHW image tensor.
    x = jax.random.normal(key, (2, 4, 16, 16), dtype=jnp.float32)
    scale_factor = 2.0

    out = interpolate_bilinear(x, scale_factor=scale_factor)
    out = jax.block_until_ready(out)

    # Pure-JAX reference built from the same interpolation matrices
    # (same math, no Pallas) — validates the kernel plumbing end-to-end.
    wh_ref = _bilinear_matrix(16, 32, scale_factor)
    ww_ref = _bilinear_matrix(16, 32, scale_factor)
    ref = jnp.einsum("oh,nchw,pw->ncop", wh_ref, x, ww_ref)

    assert out.shape == (2, 4, 32, 32)
    assert jnp.allclose(out, ref, atol=1e-5, rtol=1e-5)

    print("KERNEL_OK")
</pallas_src>

<mosaic_0001>
module attributes {stable_mosaic.version = 11 : i64} {
  func.func @_interp_kernel(%arg0: i32, %arg1: memref<8x16x16xf32, #tpu.memory_space<vmem>>, %arg2: memref<32x16xf32, #tpu.memory_space<vmem>>, %arg3: memref<16x32xf32, #tpu.memory_space<vmem>>, %arg4: memref<8x32x32xf32, #tpu.memory_space<vmem>>) attributes {dimension_semantics = [#tpu.dimension_semantics<parallel>], iteration_bounds = array<i64: 1>, scalar_prefetch = 0 : i64, scratch_operands = 0 : i64, tpu.core_type = #tpu.core_type<tc>, window_params = [{transform_indices = @transform_0, window_bounds = array<i64: 8, 16, 16>}, {pipeline_mode = #tpu.pipeline_mode<synchronous>, transform_indices = @transform_1, window_bounds = array<i64: 32, 16>}, {pipeline_mode = #tpu.pipeline_mode<synchronous>, transform_indices = @transform_2, window_bounds = array<i64: 16, 32>}, {transform_indices = @transform_3, window_bounds = array<i64: 8, 32, 32>}]} {
    %c0 = arith.constant 0 : index
    %c0_0 = arith.constant 0 : index
    %c0_1 = arith.constant 0 : index
    %0 = vector.load %arg1[%c0, %c0_0, %c0_1] : memref<8x16x16xf32, #tpu.memory_space<vmem>>, vector<8x16x16xf32>
    %1 = vector.shape_cast %0 : vector<8x16x16xf32> to vector<128x16xf32>
    %c0_2 = arith.constant 0 : index
    %c0_3 = arith.constant 0 : index
    %2 = vector.load %arg3[%c0_2, %c0_3] : memref<16x32xf32, #tpu.memory_space<vmem>>, vector<16x32xf32>
    %cst = arith.constant dense<0.000000e+00> : vector<128x32xf32>
    %3 = tpu.matmul %1, %2, %cst {dimension_numbers = #tpu.dot_dimension_numbers<[1], [0], [0], [1], [0, 0, 1, 1], [], []>} : vector<128x16xf32>, vector<16x32xf32>, vector<128x32xf32> -> vector<128x32xf32>
    %4 = vector.shape_cast %3 : vector<128x32xf32> to vector<8x16x32xf32>
    %c0_4 = arith.constant 0 : index
    %c0_5 = arith.constant 0 : index
    %5 = vector.load %arg2[%c0_4, %c0_5] : memref<32x16xf32, #tpu.memory_space<vmem>>, vector<32x16xf32>
    %6 = vector.shape_cast %5 : vector<32x16xf32> to vector<1x32x16xf32>
    %7 = vector.broadcast %6 : vector<1x32x16xf32> to vector<8x32x16xf32>
    "tpu.trace_start"() <{level = 10 : i32, message = "boh,bhw->bow"}> : () -> ()
    %cst_6 = arith.constant dense<0.000000e+00> : vector<8x32x32xf32>
    %8 = tpu.matmul %7, %4, %cst_6 {dimension_numbers = #tpu.dot_dimension_numbers<[2], [1], [1], [2], [0, 0, 0, 1, 1, 2], [0], [0]>} : vector<8x32x16xf32>, vector<8x16x32xf32>, vector<8x32x32xf32> -> vector<8x32x32xf32>
    "tpu.trace_stop"() : () -> ()
    %c0_7 = arith.constant 0 : index
    %c0_8 = arith.constant 0 : index
    %c0_9 = arith.constant 0 : index
    %9 = vector.load %arg4[%c0_7, %c0_8, %c0_9] : memref<8x32x32xf32, #tpu.memory_space<vmem>>, vector<8x32x32xf32>
    tpu.vector_store %arg4[%c0_7, %c0_8, %c0_9], %8 {strides = array<i32>} : memref<8x32x32xf32, #tpu.memory_space<vmem>>, vector<8x32x32xf32>,
    return
  }
  func.func @transform_0(%arg0: i32) -> (i32, i32, i32) {
    %c0_i32 = arith.constant 0 : i32
    %c0_i32_0 = arith.constant 0 : i32
    %c0_i32_1 = arith.constant 0 : i32
    return %arg0, %c0_i32, %c0_i32_0 : i32, i32, i32
  }
  func.func @transform_1(%arg0: i32) -> (i32, i32) {
    %c0_i32 = arith.constant 0 : i32
    %c0_i32_0 = arith.constant 0 : i32
    %c0_i32_1 = arith.constant 0 : i32
    return %c0_i32, %c0_i32_0 : i32, i32
  }
  func.func @transform_2(%arg0: i32) -> (i32, i32) {
    %c0_i32 = arith.constant 0 : i32
    %c0_i32_0 = arith.constant 0 : i32
    %c0_i32_1 = arith.constant 0 : i32
    return %c0_i32, %c0_i32_0 : i32, i32
  }
  func.func @transform_3(%arg0: i32) -> (i32, i32, i32) {
    %c0_i32 = arith.constant 0 : i32
    %c0_i32_0 = arith.constant 0 : i32
    %c0_i32_1 = arith.constant 0 : i32
    return %arg0, %c0_i32, %c0_i32_0 : i32, i32, i32
  }
}

</mosaic_0001>

<bundles_post_ra>
// kernel: tpu_custom_call.1
= control target key start
LH: loop header
LB: loop body
LE: loop exit
PB: predicated region body
PF: predicated region fallthrough
CT: control target
= control target key end

     0   :  { %8 = vsyncpa [#allocation3], 0  ;;  %s703_s0 = inlined_call_operand.hbm [shape: f32[8,16,16], index: 0, kind: input, shape index: {}]   ;;  %s704_s1 = inlined_call_operand.vmem [shape: f32[32,16], index: 1, kind: input, shape index: {}]   ;;  %s705_s2 = inlined_call_operand.vmem [shape: f32[16,32], index: 2, kind: input, shape index: {}]   ;;  %s706_s3 = inlined_call_operand.hbm [shape: f32[8,32,32], index: 3, kind: output, shape index: {}]  }
   0x1   :  { %9 = vsyncpa [#allocation4], 0  ;;  %s14_s14 = sshll.u32 %s703_s0, 4  ;;  %s569_s15 = smov [#allocation2]   ;;  %s15_s14 = int_to_ptr.hbm [resolvable:$true] %s14_s14 }
   0x2   :  { %s16_s16 = sshll.u32 %s569_s15, 4  ;;  %s570_s17 = smov 128   ;;  %s17_s16 = int_to_ptr.vmem [resolvable:$true] %s16_s16 }
   0x3   :  { %s571_s18 = smov 8  }
   0x4   :  { %22 = dma.hbm_to_vmem [thread:$0]  %s15_s14, 2048, %s17_s16, [#allocation3], %s570_s17, %s570_s17, %s571_s18  }
   0x5   :  { %565 = dma.done.wait [#allocation3], 2048  }
   0x6   :  { %566 = vsyncadd [#allocation3], 4294965248  ;;  %v48_v0 = vld [vmem:[%s705_s2 + $0x8] sm:$0xff]  ;;  %v47_v1 = vld [vmem:[%s705_s2] sm:$0xff]  ;;  %vm49_vm0 = vcmask 130048   ;;  %vm411_vm1 = vcmask 261120  }
   0x7   :  { %112 = vmatpush.msra.mxu0 %v48_v0  ;;  %v31_v2 = vld [vmem:[#allocation2] sm:$0xff]  ;;  %511 = vmatpush.msra.mxu3 %v48_v0  ;;  %v32_v3 = vld [vmem:[#allocation2 + $0x8] sm:$0xff]  ;;  %v33_v4 = vld [vmem:[#allocation2 + $0x10] sm:$0xff]  ;;  %s450_s5 = sshll.u32 %s706_s3, 4  ;;  %s451_s5 = int_to_ptr.hbm [resolvable:$true] %s450_s5 }
   0x8   :  { %v34_v5 = vld [vmem:[#allocation2 + $0x18] sm:$0xff]  ;;  %v35_v6 = vld [vmem:[#allocation2 + $0x20] sm:$0xff]  ;;  %v36_v8 = vld [vmem:[#allocation2 + $0x28] sm:$0xff] }
   0x9   :  { %113 = vmatpush.msra.mxu0 %v47_v1  ;;  %512 = vmatpush.msra.mxu3 %v47_v1  ;;  %v43_v7 = vld [vmem:[#allocation2 + $0x60] sm:$0xff]  ;;  %v44_v9 = vld [vmem:[#allocation2 + $0x68] sm:$0xff]  ;;  %v37_v10 = vld [vmem:[#allocation2 + $0x30] sm:$0xff] }
   0xa   :  { %463 = vmatmul.msk.f32.vlgmr.msra.gmra.mxu0 %vm49_vm0, %v31_v2  ;;  %475 = vmatmul.msk.f32.vlgmr.msra.gmra.mxu3 %vm49_vm0, %v43_v7  ;;  %v45_v11 = vld [vmem:[#allocation2 + $0x70] sm:$0xff]  ;;  %v38_v12 = vld [vmem:[#allocation2 + $0x38] sm:$0xff]  ;;  %v39_v14 = vld [vmem:[#allocation2 + $0x40] sm:$0xff] }
   0xb   :  { %v46_v13 = vld [vmem:[#allocation2 + $0x78] sm:$0xff]  ;;  %v40_v15 = vld [vmem:[#allocation2 + $0x48] sm:$0xff]  ;;  %v41_v16 = vld [vmem:[#allocation2 + $0x50] sm:$0xff] }
   0xc   :  { %v42_v17 = vld [vmem:[#allocation2 + $0x58] sm:$0xff]  ;;  %v163_v20 = vld [vmem:[%s704_s1] sm:$0xff]  ;;  %v164_v22 = vld [vmem:[%s704_s1 + $0x8] sm:$0xff] }
   0xd   :  { %v165_v24 = vld [vmem:[%s704_s1 + $0x10] sm:$0xff]  ;;  %v166_v26 = vld [vmem:[%s704_s1 + $0x18] sm:$0xff]  ;;  %s572_s1 = smov [#allocation5]  }
   0xe   :  { %s448_s29 = sshll.u32 %s572_s1, 4  ;;  %s449_s29 = int_to_ptr.vmem [resolvable:$true] %s448_s29 }
  0x12   :  { %464 = vmatmul.msk.f32.gmra.mxu0 %vm49_vm0, %v32_v3  ;;  %476 = vmatmul.msk.f32.gmra.mxu3 %vm49_vm0, %v44_v9 }
  0x1a   :  { %465 = vmatmul.msk.f32.gmra.mxu0 %vm49_vm0, %v33_v4  ;;  %477 = vmatmul.msk.f32.gmra.mxu3 %vm49_vm0, %v45_v11 }
  0x22   :  { %466 = vmatmul.msk.f32.gmra.mxu0 %vm49_vm0, %v34_v5  ;;  %478 = vmatmul.msk.f32.gmra.mxu3 %vm49_vm0, %v46_v13 }
  0x2a   :  { %467 = vmatmul.msk.f32.gmra.mxu0 %vm49_vm0, %v35_v6 }
  0x32   :  { %468 = vmatmul.msk.f32.gmra.mxu0 %vm49_vm0, %v36_v8 }
  0x3a   :  { %469 = vmatmul.msk.f32.gmra.mxu0 %vm49_vm0, %v37_v10 }
  0x42   :  { %470 = vmatmul.msk.f32.gmra.mxu0 %vm49_vm0, %v38_v12 }
  0x4a   :  { %471 = vmatmul.msk.f32.gmra.mxu0 %vm49_vm0, %v39_v14 }
  0x52   :  { %472 = vmatmul.msk.f32.gmra.mxu0 %vm49_vm0, %v40_v15 }
  0x5a   :  { %473 = vmatmul.msk.f32.gmra.mxu0 %vm49_vm0, %v41_v16 }
  0x62   :  { %474 = vmatmul.msk.f32.gmra.mxu0 %vm49_vm0, %v42_v17 }
  0x87   :  { %v115_v18 = vpop.f32.mrf.mxu0 }
  0x8d   :  { %v151_v28 = vpop.f32.mrf.mxu3 }
  0x8f   :  { %v118_v19 = vpop.f32.mrf.mxu0 }
  0x90   :  { %193 = vmatpush.msra.mxu1 %v118_v19 }
  0x92   :  { %194 = vmatpush.msra.mxu1 %v115_v18 }
  0x93   :  { %479 = vmatmul.msk.f32.vlgmr.msra.gmra.mxu1 %vm49_vm0, %v163_v20 }
  0x95   :  { %v154_v30 = vpop.f32.mrf.mxu3 }
  0x97   :  { %v121_v21 = vpop.f32.mrf.mxu0 }
  0x9b   :  { %480 = vmatmul.msk.f32.gmra.mxu1 %vm49_vm0, %v164_v22 }
  0x9d   :  { %v157_v32 = vpop.f32.mrf.mxu3 }
  0x9f   :  { %v124_v23 = vpop.f32.mrf.mxu0 }
  0xa0   :  { %222 = vmatpush.msra.mxu2 %v124_v23 }
  0xa2   :  { %223 = vmatpush.msra.mxu2 %v121_v21 }
  0xa3   :  { %483 = vmatmul.msk.f32.vlgmr.msra.gmra.mxu2 %vm49_vm0, %v163_v20  ;;  %481 = vmatmul.msk.f32.gmra.mxu1 %vm49_vm0, %v165_v24 }
  0xa5   :  { %v160_v35 = vpop.f32.mrf.mxu3 }
  0xa7   :  { %v127_v25 = vpop.f32.mrf.mxu0 }
  0xab   :  { %484 = vmatmul.msk.f32.gmra.mxu2 %vm49_vm0, %v164_v22  ;;  %482 = vmatmul.msk.f32.gmra.mxu1 %vm49_vm0, %v166_v26 }
  0xaf   :  { %v130_v27 = vpop.f32.mrf.mxu0 }
  0xb0   :  { %251 = vmatpush.msrb.mxu3 %v130_v27 }
  0xb2   :  { %252 = vmatpush.msrb.mxu3 %v127_v25 }
  0xb3   :  { %485 = vmatmul.msk.f32.gmra.mxu2 %vm49_vm0, %v165_v24  ;;  %487 = vmatmul.msk.f32.vlgmr.msrb.gmra.mxu3 %vm49_vm0, %v163_v20 }
  0xb7   :  { %v133_v29 = vpop.f32.mrf.mxu0 }
  0xbb   :  { %486 = vmatmul.msk.f32.gmra.mxu2 %vm49_vm0, %v166_v26  ;;  %488 = vmatmul.msk.f32.gmra.mxu3 %vm49_vm0, %v164_v22 }
  0xbf   :  { %v136_v31 = vpop.f32.mrf.mxu0 }
  0xc0   :  { %280 = vmatpush.msrb.mxu1 %v136_v31 }
  0xc2   :  { %281 = vmatpush.msrb.mxu1 %v133_v29 }
  0xc3   :  { %489 = vmatmul.msk.f32.gmra.mxu3 %vm49_vm0, %v165_v24  ;;  %491 = vmatmul.msk.f32.vlgmr.msrb.gmra.mxu1 %vm49_vm0, %v163_v20 }
  0xc4   :  { %367 = vmatpush.msra.mxu1 %v154_v30 }
  0xc6   :  { %368 = vmatpush.msra.mxu1 %v151_v28 }
  0xc7   :  { %v139_v33 = vpop.f32.mrf.mxu0 }
  0xcb   :  { %490 = vmatmul.msk.f32.gmra.mxu3 %vm49_vm0, %v166_v26  ;;  %492 = vmatmul.msk.f32.gmra.mxu1 %vm49_vm0, %v164_v22 }
  0xcf   :  { %v142_v34 = vpop.f32.mrf.mxu0 }
  0xd0   :  { %309 = vmatpush.msrb.mxu2 %v142_v34 }
  0xd2   :  { %310 = vmatpush.msrb.mxu2 %v139_v33 }
  0xd3   :  { %495 = vmatmul.msk.f32.vlgmr.msrb.gmra.mxu2 %vm49_vm0, %v163_v20  ;;  %493 = vmatmul.msk.f32.gmra.mxu1 %vm49_vm0, %v165_v24 }
  0xd4   :  { %396 = vmatpush.msra.mxu2 %v160_v35 }
  0xd6   :  { %397 = vmatpush.msra.mxu2 %v157_v32 }
  0xd7   :  { %v145_v36 = vpop.f32.mrf.mxu0 }
  0xdb   :  { %496 = vmatmul.msk.f32.gmra.mxu2 %vm49_vm0, %v164_v22  ;;  %494 = vmatmul.msk.f32.gmra.mxu1 %vm49_vm0, %v166_v26 }
  0xdf   :  { %v148_v37 = vpop.f32.mrf.mxu0 }
  0xe0   :  { %338 = vmatpush.msra.mxu3 %v148_v37 }
  0xe2   :  { %339 = vmatpush.msra.mxu3 %v145_v36 }
  0xe3   :  { %499 = vmatmul.msk.f32.vlgmr.msra.gmra.mxu3 %vm49_vm0, %v163_v20  ;;  %497 = vmatmul.msk.f32.gmra.mxu2 %vm49_vm0, %v165_v24 }
  0xe4   :  { %503 = vmatmul.msk.f32.vlgmr.msra.gmra.mxu1 %vm49_vm0, %v163_v20 }
  0xeb   :  { %500 = vmatmul.msk.f32.gmra.mxu3 %vm49_vm0, %v164_v22  ;;  %498 = vmatmul.msk.f32.gmra.mxu2 %vm49_vm0, %v166_v26 }
  0xec   :  { %504 = vmatmul.msk.f32.gmra.mxu1 %vm49_vm0, %v164_v22 }
  0xf3   :  { %501 = vmatmul.msk.f32.gmra.mxu3 %vm49_vm0, %v165_v24  ;;  %507 = vmatmul.msk.f32.vlgmr.msra.gmra.mxu2 %vm49_vm0, %v163_v20 }
  0xf4   :  { %505 = vmatmul.msk.f32.gmra.mxu1 %vm49_vm0, %v165_v24 }
  0xfb   :  { %502 = vmatmul.msk.f32.gmra.mxu3 %vm49_vm0, %v166_v26  ;;  %508 = vmatmul.msk.f32.gmra.mxu2 %vm49_vm0, %v164_v22 }
  0xfc   :  { %506 = vmatmul.msk.f32.gmra.mxu1 %vm49_vm0, %v166_v26 }
 0x103   :  { %509 = vmatmul.msk.f32.gmra.mxu2 %vm49_vm0, %v165_v24 }
 0x10b   :  { %510 = vmatmul.msk.f32.gmra.mxu2 %vm49_vm0, %v166_v26 }
 0x110   :  { %v196_v38 = vpop.f32.mrf.mxu1 }
 0x111   :  { %412 = vst.msk [vmem:[#allocation5] sm:$0xff] %vm411_vm1, %v196_v38 }
 0x118   :  { %v199_v39 = vpop.f32.mrf.mxu1 }
 0x119   :  { %413 = vst.msk [vmem:[#allocation5 + $0x8] sm:$0xff] %vm411_vm1, %v199_v39 }
 0x120   :  { %v202_v40 = vpop.f32.mrf.mxu1 }
 0x121   :  { %414 = vst.msk [vmem:[#allocation5 + $0x10] sm:$0xff] %vm411_vm1, %v202_v40 }
 0x126   :  { %v225_v41 = vpop.f32.mrf.mxu2 }
 0x127   :  { %416 = vst.msk [vmem:[#allocation5 + $0x20] sm:$0xff] %vm411_vm1, %v225_v41 }
 0x128   :  { %v205_v42 = vpop.f32.mrf.mxu1 }
 0x129   :  { %415 = vst.msk [vmem:[#allocation5 + $0x18] sm:$0xff] %vm411_vm1, %v205_v42 }
 0x12e   :  { %v228_v43 = vpop.f32.mrf.mxu2 }
 0x12f   :  { %417 = vst.msk [vmem:[#allocation5 + $0x28] sm:$0xff] %vm411_vm1, %v228_v43 }
 0x136   :  { %v231_v44 = vpop.f32.mrf.mxu2  ;;  %v254_v45 = vpop.f32.mrf.mxu3 }
 0x137   :  { %418 = vst.msk [vmem:[#allocation5 + $0x30] sm:$0xff] %vm411_vm1, %v231_v44 }
 0x138   :  { %420 = vst.msk [vmem:[#allocation5 + $0x40] sm:$0xff] %vm411_vm1, %v254_v45 }
 0x13e   :  { %v234_v46 = vpop.f32.mrf.mxu2  ;;  %v257_v47 = vpop.f32.mrf.mxu3 }
 0x13f   :  { %419 = vst.msk [vmem:[#allocation5 + $0x38] sm:$0xff] %vm411_vm1, %v234_v46 }
 0x140   :  { %421 = vst.msk [vmem:[#allocation5 + $0x48] sm:$0xff] %vm411_vm1, %v257_v47  ;;  %v283_v48 = vpop.f32.mrf.mxu1 }
 0x141   :  { %424 = vst.msk [vmem:[#allocation5 + $0x60] sm:$0xff] %vm411_vm1, %v283_v48 }
 0x146   :  { %v260_v49 = vpop.f32.mrf.mxu3 }
 0x147   :  { %422 = vst.msk [vmem:[#allocation5 + $0x50] sm:$0xff] %vm411_vm1, %v260_v49 }
 0x148   :  { %v286_v50 = vpop.f32.mrf.mxu1 }
 0x149   :  { %425 = vst.msk [vmem:[#allocation5 + $0x68] sm:$0xff] %vm411_vm1, %v286_v50 }
 0x14e   :  { %v263_v51 = vpop.f32.mrf.mxu3 }
 0x14f   :  { %423 = vst.msk [vmem:[#allocation5 + $0x58] sm:$0xff] %vm411_vm1, %v263_v51 }
 0x150   :  { %v289_v52 = vpop.f32.mrf.mxu1 }
 0x151   :  { %426 = vst.msk [vmem:[#allocation5 + $0x70] sm:$0xff] %vm411_vm1, %v289_v52 }
 0x156   :  { %v312_v53 = vpop.f32.mrf.mxu2 }
 0x157   :  { %428 = vst.msk [vmem:[#allocation5 + $0x80] sm:$0xff] %vm411_vm1, %v312_v53 }
 0x158   :  { %v292_v54 = vpop.f32.mrf.mxu1 }
 0x159   :  { %427 = vst.msk [vmem:[#allocation5 + $0x78] sm:$0xff] %vm411_vm1, %v292_v54 }
 0x15e   :  { %v315_v55 = vpop.f32.mrf.mxu2 }
 0x15f   :  { %429 = vst.msk [vmem:[#allocation5 + $0x88] sm:$0xff] %vm411_vm1, %v315_v55 }
 0x161   :  { %v370_v56 = vpop.f32.mrf.mxu1 }
 0x162   :  { %436 = vst.msk [vmem:[#allocation5 + $0xc0] sm:$0xff] %vm411_vm1, %v370_v56 }
 0x166   :  { %v341_v57 = vpop.f32.mrf.mxu3  ;;  %v318_v58 = vpop.f32.mrf.mxu2 }
 0x167   :  { %432 = vst.msk [vmem:[#allocation5 + $0xa0] sm:$0xff] %vm411_vm1, %v341_v57 }
 0x168   :  { %430 = vst.msk [vmem:[#allocation5 + $0x90] sm:$0xff] %vm411_vm1, %v318_v58 }
 0x169   :  { %v373_v59 = vpop.f32.mrf.mxu1 }
 0x16a   :  { %437 = vst.msk [vmem:[#allocation5 + $0xc8] sm:$0xff] %vm411_vm1, %v373_v59 }
 0x16e   :  { %v344_v60 = vpop.f32.mrf.mxu3  ;;  %v321_v61 = vpop.f32.mrf.mxu2 }
 0x16f   :  { %433 = vst.msk [vmem:[#allocation5 + $0xa8] sm:$0xff] %vm411_vm1, %v344_v60 }
 0x170   :  { %431 = vst.msk [vmem:[#allocation5 + $0x98] sm:$0xff] %vm411_vm1, %v321_v61 }
 0x171   :  { %v376_v62 = vpop.f32.mrf.mxu1 }
 0x172   :  { %438 = vst.msk [vmem:[#allocation5 + $0xd0] sm:$0xff] %vm411_vm1, %v376_v62 }
 0x176   :  { %v347_v63 = vpop.f32.mrf.mxu3  ;;  %v399_v0 = vpop.f32.mrf.mxu2 }
 0x177   :  { %434 = vst.msk [vmem:[#allocation5 + $0xb0] sm:$0xff] %vm411_vm1, %v347_v63 }
 0x178   :  { %440 = vst.msk [vmem:[#allocation5 + $0xe0] sm:$0xff] %vm411_vm1, %v399_v0 }
 0x179   :  { %v379_v1 = vpop.f32.mrf.mxu1 }
 0x17a   :  { %439 = vst.msk [vmem:[#allocation5 + $0xd8] sm:$0xff] %vm411_vm1, %v379_v1 }
 0x17e   :  { %v350_v2 = vpop.f32.mrf.mxu3  ;;  %v402_v3 = vpop.f32.mrf.mxu2 }
 0x17f   :  { %435 = vst.msk [vmem:[#allocation5 + $0xb8] sm:$0xff] %vm411_vm1, %v350_v2 }
 0x180   :  { %441 = vst.msk [vmem:[#allocation5 + $0xe8] sm:$0xff] %vm411_vm1, %v402_v3 }
 0x186   :  { %v405_v4 = vpop.f32.mrf.mxu2 }
 0x187   :  { %442 = vst.msk [vmem:[#allocation5 + $0xf0] sm:$0xff] %vm411_vm1, %v405_v4 }
 0x18e   :  { %v408_v5 = vpop.f32.mrf.mxu2 }
 0x18f   :  { %443 = vst.msk [vmem:[#allocation5 + $0xf8] sm:$0xff] %vm411_vm1, %v408_v5 }
 0x190   :  { %456 = dma.vmem_to_hbm [thread:$0]  %s449_s29, 4096, %s451_s5, [#allocation4], %s570_s17, %s570_s17, %s571_s18  }
 0x191   :  { %567 = dma.done.wait [#allocation4], 4096  }
 0x192   :  { %568 = vsyncadd [#allocation4], 4294963200 }
 0x193   :  { %461 = vsyncpa [#allocation3], 1 }
 0x194   :  { %462 = vsyncpa [#allocation4], 1 }

</bundles_post_ra>
